<compile_context>
chip_gen: v7x
topology: tpu7x:2x2x1
jax: 0.10.0
libtpu: 0.0.40
codegen_flags: <defaults>
</compile_context>

<pallas_src>
import functools

import jax
import jax.numpy as jnp
from jax.experimental import pallas as pl
from jax.experimental.pallas import tpu as pltpu

hidden_size = 64
latent_size = 16
seq_length = 15


def _decoder_kernel(z_ref, w1_ref, b1_ref, w2_ref, b2_ref, o_ref):
    # Cast the tiny (TM, 16) activation tile to bf16 in-kernel (saves a
    # separate XLA pad/cast pass in the wrapper).
    z = z_ref[...].astype(jnp.bfloat16)
    # fc1 on the MXU (bf16 x bf16 -> f32 accumulate) + bias + relu.
    h = jnp.dot(z, w1_ref[...], preferred_element_type=jnp.float32)
    h = jnp.maximum(h + b1_ref[...], 0.0)
    # fc2 on the MXU + bias.
    y = jnp.dot(h.astype(jnp.bfloat16), w2_ref[...],
                preferred_element_type=jnp.float32)
    y = y + b2_ref[...]
    # sigmoid(x) = 0.5 * (tanh(0.5 x) + 1): one EUP transcendental per vreg.
    o_ref[...] = (0.5 * (jnp.tanh(0.5 * y) + 1.0)).astype(o_ref.dtype)


def prepare_params(w1, b1, w2, b2):
    """Cast matmul operands to bf16; biases stay f32 as (1, n) rows.

    Layout is (in, out), i.e. already transposed vs. torch's Linear weight.
      w1: (latent, hidden) bf16   b1: (1, hidden) f32
      w2: (hidden, N)      bf16   b2: (1, N)      f32   N = seq_length * output_size
    """
    return (w1.astype(jnp.bfloat16),
            b1.reshape(1, -1).astype(jnp.float32),
            w2.astype(jnp.bfloat16),
            b2.reshape(1, -1).astype(jnp.float32))


@functools.partial(jax.jit, static_argnames=("output_size", "tm", "out_dtype"))
def decoder_forward(z, params, output_size, *, tm=1024, out_dtype=jnp.float32):
    """z: (B, latent_size) f32 -> (B, seq_length, output_size) out_dtype."""
    w1, b1, w2, b2 = params
    B, L = z.shape
    H = w1.shape[1]
    N = w2.shape[1]

    # Row tile: multiple of 8, capped by `tm` and by round_up(ceil(B/2), 8) so
    # any batch >= 16 rows yields at least 2 grid steps (both TCs on v7x).
    half_rows = pl.cdiv(pl.cdiv(B, 2), 8) * 8
    TM = max(8, min(int(tm), half_rows))
    BP = pl.cdiv(B, TM) * TM
    grid = (BP // TM,)

    # Only materialize a padded copy of z when padding is actually required.
    if BP == B:
        z_in = z
    else:
        z_in = jnp.zeros((BP, L), z.dtype).at[:B].set(z)

    out_itemsize = jnp.dtype(out_dtype).itemsize
    cost = pl.CostEstimate(
        flops=2 * BP * (L * H + H * N),
        transcendentals=BP * N,
        bytes_accessed=(BP * L * z.dtype.itemsize
                        + BP * N * out_itemsize
                        + (L * H + H * N) * 2 + (H + N) * 4),
    )

    out_flat = pl.pallas_call(
        _decoder_kernel,
        out_shape=jax.ShapeDtypeStruct((BP, N), out_dtype),
        grid_spec=pltpu.PrefetchScalarGridSpec(
            num_scalar_prefetch=0,
            grid=grid,
            in_specs=[
                # Batch-tiled activations.
                pl.BlockSpec((TM, L), lambda i: (i, 0)),
                # Tiny weights/biases: constant index map -> VMEM-resident.
                pl.BlockSpec(w1.shape, lambda i: (0, 0)),
                pl.BlockSpec(b1.shape, lambda i: (0, 0)),
                pl.BlockSpec(w2.shape, lambda i: (0, 0)),
                pl.BlockSpec(b2.shape, lambda i: (0, 0)),
            ],
            # Block last dim == full array dim (120): no padded lanes written.
            out_specs=pl.BlockSpec((TM, N), lambda i: (i, 0)),
        ),
        compiler_params=pltpu.CompilerParams(
            dimension_semantics=("parallel",),   # shard batch tiles across TCs (v7x)
        ),
        cost_estimate=cost,
    )(z_in, w1, b1, w2, b2)

    out = out_flat if BP == B else out_flat[:B]
    return out.reshape(B, seq_length, output_size)


def init_params(key, latent, hidden, output_size):
    """Synthetic init (uniform, like torch's default Linear init), (in, out) layout."""
    k1, k2, k3, k4 = jax.random.split(key, 4)
    N = output_size * seq_length
    lim1 = 1.0 / jnp.sqrt(latent)
    lim2 = 1.0 / jnp.sqrt(hidden)
    w1 = jax.random.uniform(k1, (latent, hidden), jnp.float32, -lim1, lim1)
    b1 = jax.random.uniform(k2, (hidden,), jnp.float32, -lim1, lim1)
    w2 = jax.random.uniform(k3, (hidden, N), jnp.float32, -lim2, lim2)
    b2 = jax.random.uniform(k4, (N,), jnp.float32, -lim2, lim2)
    return (w1, b1, w2, b2)


def _reference(z, params, output_size):
    """Same math as the kernel (bf16 matmul operands, f32 accumulation) in plain JAX."""
    w1, b1, w2, b2 = params
    h = jnp.maximum(
        jnp.dot(z.astype(jnp.bfloat16), w1, preferred_element_type=jnp.float32) + b1,
        0.0)
    y = jax.nn.sigmoid(
        jnp.dot(h.astype(jnp.bfloat16), w2, preferred_element_type=jnp.float32) + b2)
    return y.reshape(z.shape[0], seq_length, output_size)


if __name__ == "__main__":
    output_size = 8

    key = jax.random.PRNGKey(0)
    kp, kz1, kz2 = jax.random.split(key, 3)
    raw_params = init_params(kp, latent_size, hidden_size, output_size)
    params = prepare_params(*raw_params)

    # --- small case (single grid step, padded batch rows) ---
    batch = 2
    z = jax.random.normal(kz1, (batch, latent_size), jnp.float32)
    out = jax.block_until_ready(decoder_forward(z, params, output_size))
    assert out.shape == (batch, seq_length, output_size)
    assert out.dtype == jnp.float32

    ref_bf16 = _reference(z, params, output_size)
    assert jnp.allclose(out, ref_bf16, atol=5e-3, rtol=5e-3), "mismatch vs bf16 reference"

    # Sanity check vs full-f32 torch-equivalent math (loose tol for bf16 operands).
    w1, b1, w2, b2 = raw_params
    h32 = jnp.maximum(z @ w1 + b1, 0.0)
    ref_f32 = jax.nn.sigmoid(h32 @ w2 + b2).reshape(batch, seq_length, output_size)
    assert jnp.allclose(out, ref_f32, atol=1e-1), "mismatch vs f32 reference"

    # --- larger case exercising multiple grid steps + batch padding ---
    batch2 = 300
    z2 = jax.random.normal(kz2, (batch2, latent_size), jnp.float32)
    out2 = jax.block_until_ready(decoder_forward(z2, params, output_size, tm=128))
    assert out2.shape == (batch2, seq_length, output_size)
    assert jnp.allclose(out2, _reference(z2, params, output_size),
                        atol=5e-3, rtol=5e-3), "mismatch vs bf16 reference (tiled)"

    # --- bf16-output fast path (halved writeback), loose tolerance ---
    out_bf = jax.block_until_ready(
        decoder_forward(z2, params, output_size, out_dtype=jnp.bfloat16))
    assert out_bf.dtype == jnp.bfloat16
    assert jnp.allclose(out_bf.astype(jnp.float32),
                        _reference(z2, params, output_size),
                        atol=1e-2, rtol=1e-2), "mismatch vs reference (bf16 out)"

    print("KERNEL_OK")
</pallas_src>

<mosaic_0001>
module attributes {stable_mosaic.version = 11 : i64} {
  func.func @_decoder_kernel(%arg0: i32, %arg1: memref<8x16xf32, #tpu.memory_space<vmem>>, %arg2: memref<16x64xbf16, #tpu.memory_space<vmem>>, %arg3: memref<1x64xf32, #tpu.memory_space<vmem>>, %arg4: memref<64x120xbf16, #tpu.memory_space<vmem>>, %arg5: memref<1x120xf32, #tpu.memory_space<vmem>>, %arg6: memref<8x120xf32, #tpu.memory_space<vmem>>) attributes {dimension_semantics = [#tpu.dimension_semantics<parallel>], iteration_bounds = array<i64: 1>, scalar_prefetch = 0 : i64, scratch_operands = 0 : i64, tpu.core_type = #tpu.core_type<tc>, window_params = [{transform_indices = @transform_0, window_bounds = array<i64: 8, 16>}, {pipeline_mode = #tpu.pipeline_mode<synchronous>, transform_indices = @transform_1, window_bounds = array<i64: 16, 64>}, {pipeline_mode = #tpu.pipeline_mode<synchronous>, transform_indices = @transform_2, window_bounds = array<i64: 1, 64>}, {pipeline_mode = #tpu.pipeline_mode<synchronous>, transform_indices = @transform_3, window_bounds = array<i64: 64, 120>}, {pipeline_mode = #tpu.pipeline_mode<synchronous>, transform_indices = @transform_4, window_bounds = array<i64: 1, 120>}, {transform_indices = @transform_5, window_bounds = array<i64: 8, 120>}]} {
    %c0 = arith.constant 0 : index
    %c0_0 = arith.constant 0 : index
    %0 = vector.load %arg1[%c0, %c0_0] : memref<8x16xf32, #tpu.memory_space<vmem>>, vector<8x16xf32>
    %1 = arith.truncf %0 : vector<8x16xf32> to vector<8x16xbf16>
    %c0_1 = arith.constant 0 : index
    %c0_2 = arith.constant 0 : index
    %2 = vector.load %arg2[%c0_1, %c0_2] : memref<16x64xbf16, #tpu.memory_space<vmem>>, vector<16x64xbf16>
    %cst = arith.constant dense<0.000000e+00> : vector<8x64xf32>
    %3 = tpu.matmul %1, %2, %cst {dimension_numbers = #tpu.dot_dimension_numbers<[1], [0], [0], [1], [0, 0, 1, 1], [], []>} : vector<8x16xbf16>, vector<16x64xbf16>, vector<8x64xf32> -> vector<8x64xf32>
    %c0_3 = arith.constant 0 : index
    %c0_4 = arith.constant 0 : index
    %4 = vector.load %arg3[%c0_3, %c0_4] : memref<1x64xf32, #tpu.memory_space<vmem>>, vector<1x64xf32>
    %5 = vector.broadcast %4 : vector<1x64xf32> to vector<8x64xf32>
    %6 = arith.addf %3, %5 : vector<8x64xf32>
    %cst_5 = arith.constant 0.000000e+00 : f32
    %7 = vector.broadcast %cst_5 : f32 to vector<8x64xf32>
    %8 = arith.maximumf %6, %7 : vector<8x64xf32>
    %9 = arith.truncf %8 : vector<8x64xf32> to vector<8x64xbf16>
    %c0_6 = arith.constant 0 : index
    %c0_7 = arith.constant 0 : index
    %10 = vector.load %arg4[%c0_6, %c0_7] : memref<64x120xbf16, #tpu.memory_space<vmem>>, vector<64x120xbf16>
    %cst_8 = arith.constant dense<0.000000e+00> : vector<8x120xf32>
    %11 = tpu.matmul %9, %10, %cst_8 {dimension_numbers = #tpu.dot_dimension_numbers<[1], [0], [0], [1], [0, 0, 1, 1], [], []>} : vector<8x64xbf16>, vector<64x120xbf16>, vector<8x120xf32> -> vector<8x120xf32>
    %c0_9 = arith.constant 0 : index
    %c0_10 = arith.constant 0 : index
    %12 = vector.load %arg5[%c0_9, %c0_10] : memref<1x120xf32, #tpu.memory_space<vmem>>, vector<1x120xf32>
    %13 = vector.broadcast %12 : vector<1x120xf32> to vector<8x120xf32>
    %14 = arith.addf %11, %13 : vector<8x120xf32>
    %cst_11 = arith.constant 5.000000e-01 : f32
    %15 = vector.broadcast %cst_11 : f32 to vector<8x120xf32>
    %16 = arith.mulf %15, %14 : vector<8x120xf32>
    %17 = math.tanh %16 : vector<8x120xf32>
    %cst_12 = arith.constant 1.000000e+00 : f32
    %18 = vector.broadcast %cst_12 : f32 to vector<8x120xf32>
    %19 = arith.addf %17, %18 : vector<8x120xf32>
    %cst_13 = arith.constant 5.000000e-01 : f32
    %20 = vector.broadcast %cst_13 : f32 to vector<8x120xf32>
    %21 = arith.mulf %20, %19 : vector<8x120xf32>
    %c0_14 = arith.constant 0 : index
    %c0_15 = arith.constant 0 : index
    %22 = vector.load %arg6[%c0_14, %c0_15] : memref<8x120xf32, #tpu.memory_space<vmem>>, vector<8x120xf32>
    tpu.vector_store %arg6[%c0_14, %c0_15], %21 {strides = array<i32>} : memref<8x120xf32, #tpu.memory_space<vmem>>, vector<8x120xf32>,
    return
  }
  func.func @transform_0(%arg0: i32) -> (i32, i32) {
    %c0_i32 = arith.constant 0 : i32
    %c0_i32_0 = arith.constant 0 : i32
    return %arg0, %c0_i32 : i32, i32
  }
  func.func @transform_1(%arg0: i32) -> (i32, i32) {
    %c0_i32 = arith.constant 0 : i32
    %c0_i32_0 = arith.constant 0 : i32
    %c0_i32_1 = arith.constant 0 : i32
    return %c0_i32, %c0_i32_0 : i32, i32
  }
  func.func @transform_2(%arg0: i32) -> (i32, i32) {
    %c0_i32 = arith.constant 0 : i32
    %c0_i32_0 = arith.constant 0 : i32
    %c0_i32_1 = arith.constant 0 : i32
    return %c0_i32, %c0_i32_0 : i32, i32
  }
  func.func @transform_3(%arg0: i32) -> (i32, i32) {
    %c0_i32 = arith.constant 0 : i32
    %c0_i32_0 = arith.constant 0 : i32
    %c0_i32_1 = arith.constant 0 : i32
    return %c0_i32, %c0_i32_0 : i32, i32
  }
  func.func @transform_4(%arg0: i32) -> (i32, i32) {
    %c0_i32 = arith.constant 0 : i32
    %c0_i32_0 = arith.constant 0 : i32
    %c0_i32_1 = arith.constant 0 : i32
    return %c0_i32, %c0_i32_0 : i32, i32
  }
  func.func @transform_5(%arg0: i32) -> (i32, i32) {
    %c0_i32 = arith.constant 0 : i32
    %c0_i32_0 = arith.constant 0 : i32
    return %arg0, %c0_i32 : i32, i32
  }
}

</mosaic_0001>

<bundles_post_ra>
// kernel: decoder_forward.1
= control target key start
LH: loop header
LB: loop body
LE: loop exit
PB: predicated region body
PF: predicated region fallthrough
CT: control target
= control target key end

     0   :  { %10 = vsyncpa [#allocation3], 0  ;;  %s262_s18 = smov [#allocation2]   ;;  %s324_s0 = inlined_call_operand.vmem [shape: f32[8,16], index: 0, kind: input, shape index: {}]   ;;  %s325_s1 = inlined_call_operand.vmem [shape: bf16[16,64], index: 1, kind: input, shape index: {}]   ;;  %s326_s2 = inlined_call_operand.vmem [shape: f32[1,64], index: 2, kind: input, shape index: {}]   ;;  %s327_s3 = inlined_call_operand.hbm [shape: bf16[64,120], index: 3, kind: input, shape index: {}]   ;;  %s328_s4 = inlined_call_operand.vmem [shape: f32[1,120], index: 4, kind: input, shape index: {}]   ;;  %s329_s5 = inlined_call_operand.vmem [shape: f32[8,120], index: 5, kind: output, shape index: {}]  }
   0x1   :  { %s22_s19 = sshll.u32 %s262_s18, 4  ;;  %s238_s22 = scalar_lea.hbm %s327_s3, 512  ;;  %s23_s19 = int_to_ptr.vmem [resolvable:$true] %s22_s19 }
   0x2   :  { %p239_p0 = scmp.ne.s32.totalorder %s327_s3, %s238_s22  ;;  %p242_p1 = scmp.lt.u32.totalorder %s238_s22, %s327_s3 }
   0x4   :  { %p244_p2 = pnand %p242_p1, %p239_p0 }
   0x6   :  { %247 = shalt.err (!%p244_p2)
}
   0x7   :  { %s248_s27 = scalar_lea.vmem %s23_s19, 512  ;;  %p253_p4 = scmp.lt.s32.totalorder %s23_s19, %s23_s19 }
   0x8   :  { %p249_p3 = scmp.ne.s32.totalorder %s23_s19, %s248_s27  ;;  %p254_p5 = scmp.lt.s32.totalorder %s248_s27, %s248_s27 }
   0xa   :  { %p255_p6 = por %p254_p5, %p253_p4 }
   0xc   :  { %p256_p7 = pnand %p255_p6, %p249_p3 }
   0xe   :  { %259 = shalt.err (!%p256_p7)
}
   0xf   :  { %s263_s28 = smov 64   ;;  %s264_s29 = smov 4  }
  0x10   :  { %28 = dma.hbm_to_vmem [thread:$0]  %s327_s3, 512, %s23_s19, [#allocation3], %s263_s28, %s263_s28, %s264_s29  }
  0x11   :  { %260 = dma.done.wait [#allocation3], 512  }
  0x12   :  { %261 = vsyncadd [#allocation3], 4294966784  ;;  %v265_v0 = vmov 0.0   ;;  %vm266_vm0 = vmmov 0   ;;  %v231_v1 = vld [vmem:[%s325_s1] sm:$0xff]   ;;  %vm52_vm1 = vcmask 130048  }
  0x13   :  { %208 = vmatprep.subr.bf16.mxu0 %v265_v0  ;;  %210 = vmatprep.mubr.msk.bf16.mxu0 %vm266_vm0, %v265_v0  ;;  %v35_v2 = vld [vmem:[%s324_s0] sm:$0xff]  ;;  %v233_v5 = vld [vmem:[#allocation2 + $0x8] sm:$0xff]   ;;  %v234_v6 = vld [vmem:[#allocation2 + $0x10] sm:$0xff]   ;;  %vm137_vm2 = vcmask 523264   ;;  %vm185_vm3 = vcmask 982016  }
  0x14   :  { %214 = vmatprep.subr.bf16.mxu1 %v265_v0  ;;  %222 = vmatprep.mubr.msk.bf16.mxu1 %vm266_vm0, %v265_v0  ;;  %v36_v3 = vpack.c.bf16 %v35_v2, %v35_v2  ;;  %v232_v4 = vld [vmem:[#allocation2] sm:$0xff]   ;;  %v235_v7 = vld [vmem:[#allocation2 + $0x18] sm:$0xff]  }
  0x15   :  { %209 = vmatpush3.bf16.msra.mxu0 %v231_v1  ;;  %215 = vmatpush3.bf16.msra.mxu1 %v232_v4  ;;  %v192_v8 = vld [vmem:[%s326_s2] ss:$0 sm:$0xff] }
  0x16   :  { %216 = vmatprep.subr.bf16.mxu1 %v265_v0  ;;  %v195_v16 = vld [vmem:[%s328_s4] ss:$0 sm:$0xff] }
  0x18   :  { %211 = vmatmul.mubr.msk.bf16.vlgmr.msra.gmra.mrb[0].mxu0 %vm52_vm1, %v36_v3 }
  0x19   :  { %217 = vmatpush3.bf16.msra.mxu1 %v233_v5 }
  0x1a   :  { %218 = vmatprep.subr.bf16.mxu1 %v265_v0 }
  0x1d   :  { %219 = vmatpush3.bf16.msra.mxu1 %v234_v6 }
  0x1e   :  { %220 = vmatprep.subr.bf16.mxu1 %v265_v0 }
  0x21   :  { %221 = vmatpush3.bf16.msra.mxu1 %v235_v7 }
  0xeb   :  { %v90_v9 = vpop.f32.mrb[0].mxu0 }
  0xec   :  { %v91_v10 = vadd.f32 %v192_v8, %v90_v9  ;;  %v212_v11 = vpop.f32.mrb[1].mxu0 }
  0xed   :  { %v93_v12 = vpop.f32.mrb[2].mxu0 }
  0xee   :  { %v96_v13 = vmax.f32 %v91_v10, 0.0  ;;  %v213_v14 = vpop.f32.mrb[3].mxu0 }
  0xf0   :  { %v97_v15 = vpack.c.bf16 %v96_v13, %v96_v13 }
  0xf2   :  { %223 = vmatmul.mubr.msk.bf16.vlgmr.msra.gmra.mrb[0].mxu1 %vm137_vm2, %v97_v15 }
 0x1c5   :  { %v175_v17 = vpop.f32.mrb[0].mxu1 }
 0x1c6   :  { %v176_v18 = vadd.f32 %v195_v16, %v175_v17  ;;  %v224_v19 = vpop.f32.mrb[1].mxu1 }
 0x1c7   :  { %v178_v20 = vpop.f32.mrb[2].mxu1 }
 0x1c8   :  { %v181_v21 = vmul.f32 0.5, %v176_v18  ;;  %v225_v22 = vpop.f32.mrb[3].mxu1 }
 0x1ca   :  { %236 = vtanh.f32 %v181_v21 }
 0x1d4   :  { %v237_v23 = vpop.eup %236 }
 0x1d5   :  { %v183_v24 = vadd.f32 1.0, %v237_v23 }
 0x1d7   :  { %v184_v25 = vmul.f32 0.5, %v183_v24 }
 0x1d9   :  { %186 = vst.msk [vmem:[%s329_s5] sm:$0xff] %vm185_vm3, %v184_v25 }
 0x1da   :  { %191 = vsyncpa [#allocation3], 1 }

</bundles_post_ra>
